<compile_context>
chip_gen: v7x
topology: tpu7x:2x2x1
jax: 0.10.0
libtpu: 0.0.40
codegen_flags: <defaults>
</compile_context>

<pallas_src>
import jax
import jax.numpy as jnp
from jax import lax
from jax.experimental import pallas as pl
from jax.experimental.pallas import tpu as pltpu

KS = 3       # Conv3d kernel size (cubic)
R_PAD = 32   # (kh, kw, ci) taps per depth slice (27) zero-padded to a sublane multiple


def conv3d_min_softmax_kernel(x_ref, w_ref, b_ref, o_ref):
    # x_ref: (D, R_PAD, L)      f32 — per input depth dz, row r = (kh*KS+kw)*Cin + ci is
    #                                 the (kh,kw)-shifted channel-ci plane, flattened over
    #                                 (B, H, W) in the lane axis (rows 27..31 are zeros).
    # w_ref: (KS, Cout, R_PAD)  f32 — w_ref[kd, co, r] = weight[co, ci, kd, kh, kw]
    #                                 (columns 27..31 are zeros).
    # b_ref: (Cout, 1)          f32
    # o_ref: (Cout, L)          f32 — lane-dense; wrapper extracts the valid Ho x Wo region.
    D, _, L = x_ref.shape
    KSd, Cout, _ = w_ref.shape
    Do = D - KSd + 1

    # Tiny weight blocks (3 x 16 x 32) stay register resident across the depth loop.
    w_kd = [w_ref[kd] for kd in range(KSd)]          # each (Cout, R_PAD)

    # Depth loop: trace-time unrolled (Do = 6), equivalent to fori_loop(unroll=True).
    min_acc = jnp.full((Cout, L), jnp.inf, dtype=jnp.float32)
    for d in range(Do):
        # One (Cout, R_PAD) x (R_PAD, L) MXU matmul per kd, accumulated in f32.
        acc = jnp.dot(w_kd[0], x_ref[d], preferred_element_type=jnp.float32)
        for kd in range(1, KSd):
            acc = acc + jnp.dot(w_kd[kd], x_ref[d + kd],
                                preferred_element_type=jnp.float32)
        min_acc = jnp.minimum(min_acc, acc)          # min over output depth

    # Bias hoisted out of the depth loop: min(conv + b) == min(conv) + b.
    z = min_acc + b_ref[...]                         # (Cout, L)

    # Softmax over channels (sublane axis), independently per lane.
    m = jnp.max(z, axis=0, keepdims=True)
    e = jnp.exp(z - m)
    s = jnp.sum(e, axis=0, keepdims=True)
    inv = 1.0 / s                                    # exact reciprocal of one (1, L) row
    o_ref[...] = (e * inv).astype(o_ref.dtype)


@jax.jit
def conv3d_min_softmax(x_ncdhw, weight, bias):
    """x_ncdhw: (B, Cin, D, H, W); weight: (Cout, Cin, KS, KS, KS); bias: (Cout,)."""
    B, Cin, D, H, W = x_ncdhw.shape
    Cout = weight.shape[0]
    Ho, Wo = H - (KS - 1), W - (KS - 1)
    HW = H * W
    L = B * HW
    R = KS * KS * Cin            # 27 (kh, kw, ci) taps per input depth slice

    # ----------------- layout plumbing (plain JAX, outside the kernel) -----------------
    # (B, Cin, D, H, W) -> (D, Cin, B, H*W): batch concatenated into the lane axis.
    x_bp = jnp.transpose(x_ncdhw, (2, 1, 0, 3, 4)).reshape(D, Cin, B, HW)
    # Pre-shift the flattened plane for each (kh, kw) tap (wrapped lanes only feed
    # output positions the wrapper slices off), merge (9, Cin) into one tap axis,
    # and zero-pad it 27 -> 32 for dense sublane tiles / one contiguous DMA.
    x_sh = jnp.stack(
        [jnp.roll(x_bp, -(kh * W + kw), axis=-1)
         for kh in range(KS) for kw in range(KS)],
        axis=1,
    )                                                       # (D, 9, Cin, B, HW)
    x_sh = x_sh.reshape(D, R, L)                            # (D, 27, B*HW)
    x_sh = jnp.pad(x_sh, ((0, 0), (0, R_PAD - R), (0, 0)))  # (D, 32, B*HW)

    # Weights: w[kd, co, (kh*KS + kw)*Cin + ci] = weight[co, ci, kd, kh, kw], zero-padded.
    w = jnp.transpose(weight, (2, 0, 3, 4, 1)).reshape(KS, Cout, R)
    w = jnp.pad(w, ((0, 0), (0, 0), (0, R_PAD - R)))        # (KS, Cout, 32)
    b = bias.reshape(Cout, 1)

    out = pl.pallas_call(
        conv3d_min_softmax_kernel,
        out_shape=jax.ShapeDtypeStruct((Cout, L), jnp.float32),
        grid_spec=pltpu.PrefetchScalarGridSpec(
            num_scalar_prefetch=0,
            grid=(1,),  # whole problem fits comfortably in VMEM (~0.6 MiB of inputs)
            in_specs=[
                pl.BlockSpec((D, R_PAD, L), lambda i: (0, 0, 0)),
                pl.BlockSpec((KS, Cout, R_PAD), lambda i: (0, 0, 0)),
                pl.BlockSpec((Cout, 1), lambda i: (0, 0)),
            ],
            out_specs=pl.BlockSpec((Cout, L), lambda i: (0, 0)),
        ),
        compiler_params=pltpu.CompilerParams(
            dimension_semantics=("arbitrary",),
        ),
    )(x_sh, w, b)

    # Lane-dense (Cout, B*H*W) -> (B, Cout, Ho, Wo): drop the garbage lanes.
    out4 = jnp.transpose(out.reshape(Cout, B, H, W), (1, 0, 2, 3))
    return out4[:, :, :Ho, :Wo]


def _reference(x_ncdhw, weight, bias):
    conv = jax.lax.conv_general_dilated(
        x_ncdhw, weight, window_strides=(1, 1, 1), padding="VALID",
        dimension_numbers=("NCDHW", "OIDHW", "NCDHW"),
        precision=jax.lax.Precision.HIGHEST,
    ) + bias.reshape(1, -1, 1, 1, 1)
    red = jnp.min(conv, axis=2)          # min over depth (dim=2)
    return jax.nn.softmax(red, axis=1)   # softmax over channels (dim=1)


if __name__ == "__main__":
    B, Cin, Cout = 2, 3, 16
    D, H, W = 8, 16, 16

    key = jax.random.PRNGKey(0)
    kx, kw_, kb = jax.random.split(key, 3)

    x = jax.random.normal(kx, (B, Cin, D, H, W), dtype=jnp.float32)

    # Deterministic Conv3d parameter init (PyTorch-style uniform bound).
    fan_in = Cin * KS * KS * KS
    bound = 1.0 / (fan_in ** 0.5)
    weight = jax.random.uniform(kw_, (Cout, Cin, KS, KS, KS),
                                minval=-bound, maxval=bound, dtype=jnp.float32)
    bias = jax.random.uniform(kb, (Cout,), minval=-bound, maxval=bound,
                              dtype=jnp.float32)

    out = conv3d_min_softmax(x, weight, bias)
    out = jax.block_until_ready(out)

    ref = _reference(x, weight, bias)
    assert out.shape == (B, Cout, H - 2, W - 2), out.shape
    max_err = float(jnp.max(jnp.abs(out - ref)))
    assert jnp.allclose(out, ref, atol=2e-5, rtol=2e-5), max_err

    print("KERNEL_OK")
</pallas_src>

<mosaic_0001>
module attributes {stable_mosaic.version = 11 : i64} {
  func.func @conv3d_min_softmax_kernel(%arg0: i32, %arg1: memref<8x32x512xf32, #tpu.memory_space<vmem>>, %arg2: memref<3x16x32xf32, #tpu.memory_space<vmem>>, %arg3: memref<16x1xf32, #tpu.memory_space<vmem>>, %arg4: memref<16x512xf32, #tpu.memory_space<vmem>>) attributes {dimension_semantics = [#tpu.dimension_semantics<arbitrary>], iteration_bounds = array<i64: 1>, scalar_prefetch = 0 : i64, scratch_operands = 0 : i64, tpu.core_type = #tpu.core_type<tc>, window_params = [{pipeline_mode = #tpu.pipeline_mode<synchronous>, transform_indices = @transform_0, window_bounds = array<i64: 8, 32, 512>}, {pipeline_mode = #tpu.pipeline_mode<synchronous>, transform_indices = @transform_1, window_bounds = array<i64: 3, 16, 32>}, {pipeline_mode = #tpu.pipeline_mode<synchronous>, transform_indices = @transform_2, window_bounds = array<i64: 16, 1>}, {pipeline_mode = #tpu.pipeline_mode<synchronous>, transform_indices = @transform_3, window_bounds = array<i64: 16, 512>}]} {
    %c0 = arith.constant 0 : index
    %c0_0 = arith.constant 0 : index
    %c0_1 = arith.constant 0 : index
    %0 = vector.load %arg2[%c0, %c0_0, %c0_1] : memref<3x16x32xf32, #tpu.memory_space<vmem>>, vector<1x16x32xf32>
    %1 = vector.shape_cast %0 : vector<1x16x32xf32> to vector<16x32xf32>
    %c1 = arith.constant 1 : index
    %c0_2 = arith.constant 0 : index
    %c0_3 = arith.constant 0 : index
    %2 = vector.load %arg2[%c1, %c0_2, %c0_3] : memref<3x16x32xf32, #tpu.memory_space<vmem>>, vector<1x16x32xf32>
    %3 = vector.shape_cast %2 : vector<1x16x32xf32> to vector<16x32xf32>
    %c2 = arith.constant 2 : index
    %c0_4 = arith.constant 0 : index
    %c0_5 = arith.constant 0 : index
    %4 = vector.load %arg2[%c2, %c0_4, %c0_5] : memref<3x16x32xf32, #tpu.memory_space<vmem>>, vector<1x16x32xf32>
    %5 = vector.shape_cast %4 : vector<1x16x32xf32> to vector<16x32xf32>
    %cst = arith.constant 0x7F800000 : f32
    %6 = vector.broadcast %cst : f32 to vector<16x512xf32>
    %c0_6 = arith.constant 0 : index
    %c0_7 = arith.constant 0 : index
    %c0_8 = arith.constant 0 : index
    %7 = vector.load %arg1[%c0_6, %c0_7, %c0_8] : memref<8x32x512xf32, #tpu.memory_space<vmem>>, vector<1x32x512xf32>
    %8 = vector.shape_cast %7 : vector<1x32x512xf32> to vector<32x512xf32>
    %cst_9 = arith.constant dense<0.000000e+00> : vector<16x512xf32>
    %9 = tpu.matmul %1, %8, %cst_9 {dimension_numbers = #tpu.dot_dimension_numbers<[1], [0], [0], [1], [0, 0, 1, 1], [], []>} : vector<16x32xf32>, vector<32x512xf32>, vector<16x512xf32> -> vector<16x512xf32>
    %c1_10 = arith.constant 1 : index
    %c0_11 = arith.constant 0 : index
    %c0_12 = arith.constant 0 : index
    %10 = vector.load %arg1[%c1_10, %c0_11, %c0_12] : memref<8x32x512xf32, #tpu.memory_space<vmem>>, vector<1x32x512xf32>
    %11 = vector.shape_cast %10 : vector<1x32x512xf32> to vector<32x512xf32>
    %cst_13 = arith.constant dense<0.000000e+00> : vector<16x512xf32>
    %12 = tpu.matmul %3, %11, %cst_13 {dimension_numbers = #tpu.dot_dimension_numbers<[1], [0], [0], [1], [0, 0, 1, 1], [], []>} : vector<16x32xf32>, vector<32x512xf32>, vector<16x512xf32> -> vector<16x512xf32>
    %13 = arith.addf %9, %12 : vector<16x512xf32>
    %c2_14 = arith.constant 2 : index
    %c0_15 = arith.constant 0 : index
    %c0_16 = arith.constant 0 : index
    %14 = vector.load %arg1[%c2_14, %c0_15, %c0_16] : memref<8x32x512xf32, #tpu.memory_space<vmem>>, vector<1x32x512xf32>
    %15 = vector.shape_cast %14 : vector<1x32x512xf32> to vector<32x512xf32>
    %cst_17 = arith.constant dense<0.000000e+00> : vector<16x512xf32>
    %16 = tpu.matmul %5, %15, %cst_17 {dimension_numbers = #tpu.dot_dimension_numbers<[1], [0], [0], [1], [0, 0, 1, 1], [], []>} : vector<16x32xf32>, vector<32x512xf32>, vector<16x512xf32> -> vector<16x512xf32>
    %17 = arith.addf %13, %16 : vector<16x512xf32>
    %18 = arith.minimumf %6, %17 : vector<16x512xf32>
    %c1_18 = arith.constant 1 : index
    %c0_19 = arith.constant 0 : index
    %c0_20 = arith.constant 0 : index
    %19 = vector.load %arg1[%c1_18, %c0_19, %c0_20] : memref<8x32x512xf32, #tpu.memory_space<vmem>>, vector<1x32x512xf32>
    %20 = vector.shape_cast %19 : vector<1x32x512xf32> to vector<32x512xf32>
    %cst_21 = arith.constant dense<0.000000e+00> : vector<16x512xf32>
    %21 = tpu.matmul %1, %20, %cst_21 {dimension_numbers = #tpu.dot_dimension_numbers<[1], [0], [0], [1], [0, 0, 1, 1], [], []>} : vector<16x32xf32>, vector<32x512xf32>, vector<16x512xf32> -> vector<16x512xf32>
    %c2_22 = arith.constant 2 : index
    %c0_23 = arith.constant 0 : index
    %c0_24 = arith.constant 0 : index
    %22 = vector.load %arg1[%c2_22, %c0_23, %c0_24] : memref<8x32x512xf32, #tpu.memory_space<vmem>>, vector<1x32x512xf32>
    %23 = vector.shape_cast %22 : vector<1x32x512xf32> to vector<32x512xf32>
    %cst_25 = arith.constant dense<0.000000e+00> : vector<16x512xf32>
    %24 = tpu.matmul %3, %23, %cst_25 {dimension_numbers = #tpu.dot_dimension_numbers<[1], [0], [0], [1], [0, 0, 1, 1], [], []>} : vector<16x32xf32>, vector<32x512xf32>, vector<16x512xf32> -> vector<16x512xf32>
    %25 = arith.addf %21, %24 : vector<16x512xf32>
    %c3 = arith.constant 3 : index
    %c0_26 = arith.constant 0 : index
    %c0_27 = arith.constant 0 : index
    %26 = vector.load %arg1[%c3, %c0_26, %c0_27] : memref<8x32x512xf32, #tpu.memory_space<vmem>>, vector<1x32x512xf32>
    %27 = vector.shape_cast %26 : vector<1x32x512xf32> to vector<32x512xf32>
    %cst_28 = arith.constant dense<0.000000e+00> : vector<16x512xf32>
    %28 = tpu.matmul %5, %27, %cst_28 {dimension_numbers = #tpu.dot_dimension_numbers<[1], [0], [0], [1], [0, 0, 1, 1], [], []>} : vector<16x32xf32>, vector<32x512xf32>, vector<16x512xf32> -> vector<16x512xf32>
    %29 = arith.addf %25, %28 : vector<16x512xf32>
    %30 = arith.minimumf %18, %29 : vector<16x512xf32>
    %c2_29 = arith.constant 2 : index
    %c0_30 = arith.constant 0 : index
    %c0_31 = arith.constant 0 : index
    %31 = vector.load %arg1[%c2_29, %c0_30, %c0_31] : memref<8x32x512xf32, #tpu.memory_space<vmem>>, vector<1x32x512xf32>
    %32 = vector.shape_cast %31 : vector<1x32x512xf32> to vector<32x512xf32>
    %cst_32 = arith.constant dense<0.000000e+00> : vector<16x512xf32>
    %33 = tpu.matmul %1, %32, %cst_32 {dimension_numbers = #tpu.dot_dimension_numbers<[1], [0], [0], [1], [0, 0, 1, 1], [], []>} : vector<16x32xf32>, vector<32x512xf32>, vector<16x512xf32> -> vector<16x512xf32>
    %c3_33 = arith.constant 3 : index
    %c0_34 = arith.constant 0 : index
    %c0_35 = arith.constant 0 : index
    %34 = vector.load %arg1[%c3_33, %c0_34, %c0_35] : memref<8x32x512xf32, #tpu.memory_space<vmem>>, vector<1x32x512xf32>
    %35 = vector.shape_cast %34 : vector<1x32x512xf32> to vector<32x512xf32>
    %cst_36 = arith.constant dense<0.000000e+00> : vector<16x512xf32>
    %36 = tpu.matmul %3, %35, %cst_36 {dimension_numbers = #tpu.dot_dimension_numbers<[1], [0], [0], [1], [0, 0, 1, 1], [], []>} : vector<16x32xf32>, vector<32x512xf32>, vector<16x512xf32> -> vector<16x512xf32>
    %37 = arith.addf %33, %36 : vector<16x512xf32>
    %c4 = arith.constant 4 : index
    %c0_37 = arith.constant 0 : index
    %c0_38 = arith.constant 0 : index
    %38 = vector.load %arg1[%c4, %c0_37, %c0_38] : memref<8x32x512xf32, #tpu.memory_space<vmem>>, vector<1x32x512xf32>
    %39 = vector.shape_cast %38 : vector<1x32x512xf32> to vector<32x512xf32>
    %cst_39 = arith.constant dense<0.000000e+00> : vector<16x512xf32>
    %40 = tpu.matmul %5, %39, %cst_39 {dimension_numbers = #tpu.dot_dimension_numbers<[1], [0], [0], [1], [0, 0, 1, 1], [], []>} : vector<16x32xf32>, vector<32x512xf32>, vector<16x512xf32> -> vector<16x512xf32>
    %41 = arith.addf %37, %40 : vector<16x512xf32>
    %42 = arith.minimumf %30, %41 : vector<16x512xf32>
    %c3_40 = arith.constant 3 : index
    %c0_41 = arith.constant 0 : index
    %c0_42 = arith.constant 0 : index
    %43 = vector.load %arg1[%c3_40, %c0_41, %c0_42] : memref<8x32x512xf32, #tpu.memory_space<vmem>>, vector<1x32x512xf32>
    %44 = vector.shape_cast %43 : vector<1x32x512xf32> to vector<32x512xf32>
    %cst_43 = arith.constant dense<0.000000e+00> : vector<16x512xf32>
    %45 = tpu.matmul %1, %44, %cst_43 {dimension_numbers = #tpu.dot_dimension_numbers<[1], [0], [0], [1], [0, 0, 1, 1], [], []>} : vector<16x32xf32>, vector<32x512xf32>, vector<16x512xf32> -> vector<16x512xf32>
    %c4_44 = arith.constant 4 : index
    %c0_45 = arith.constant 0 : index
    %c0_46 = arith.constant 0 : index
    %46 = vector.load %arg1[%c4_44, %c0_45, %c0_46] : memref<8x32x512xf32, #tpu.memory_space<vmem>>, vector<1x32x512xf32>
    %47 = vector.shape_cast %46 : vector<1x32x512xf32> to vector<32x512xf32>
    %cst_47 = arith.constant dense<0.000000e+00> : vector<16x512xf32>
    %48 = tpu.matmul %3, %47, %cst_47 {dimension_numbers = #tpu.dot_dimension_numbers<[1], [0], [0], [1], [0, 0, 1, 1], [], []>} : vector<16x32xf32>, vector<32x512xf32>, vector<16x512xf32> -> vector<16x512xf32>
    %49 = arith.addf %45, %48 : vector<16x512xf32>
    %c5 = arith.constant 5 : index
    %c0_48 = arith.constant 0 : index
    %c0_49 = arith.constant 0 : index
    %50 = vector.load %arg1[%c5, %c0_48, %c0_49] : memref<8x32x512xf32, #tpu.memory_space<vmem>>, vector<1x32x512xf32>
    %51 = vector.shape_cast %50 : vector<1x32x512xf32> to vector<32x512xf32>
    %cst_50 = arith.constant dense<0.000000e+00> : vector<16x512xf32>
    %52 = tpu.matmul %5, %51, %cst_50 {dimension_numbers = #tpu.dot_dimension_numbers<[1], [0], [0], [1], [0, 0, 1, 1], [], []>} : vector<16x32xf32>, vector<32x512xf32>, vector<16x512xf32> -> vector<16x512xf32>
    %53 = arith.addf %49, %52 : vector<16x512xf32>
    %54 = arith.minimumf %42, %53 : vector<16x512xf32>
    %c4_51 = arith.constant 4 : index
    %c0_52 = arith.constant 0 : index
    %c0_53 = arith.constant 0 : index
    %55 = vector.load %arg1[%c4_51, %c0_52, %c0_53] : memref<8x32x512xf32, #tpu.memory_space<vmem>>, vector<1x32x512xf32>
    %56 = vector.shape_cast %55 : vector<1x32x512xf32> to vector<32x512xf32>
    %cst_54 = arith.constant dense<0.000000e+00> : vector<16x512xf32>
    %57 = tpu.matmul %1, %56, %cst_54 {dimension_numbers = #tpu.dot_dimension_numbers<[1], [0], [0], [1], [0, 0, 1, 1], [], []>} : vector<16x32xf32>, vector<32x512xf32>, vector<16x512xf32> -> vector<16x512xf32>
    %c5_55 = arith.constant 5 : index
    %c0_56 = arith.constant 0 : index
    %c0_57 = arith.constant 0 : index
    %58 = vector.load %arg1[%c5_55, %c0_56, %c0_57] : memref<8x32x512xf32, #tpu.memory_space<vmem>>, vector<1x32x512xf32>
    %59 = vector.shape_cast %58 : vector<1x32x512xf32> to vector<32x512xf32>
    %cst_58 = arith.constant dense<0.000000e+00> : vector<16x512xf32>
    %60 = tpu.matmul %3, %59, %cst_58 {dimension_numbers = #tpu.dot_dimension_numbers<[1], [0], [0], [1], [0, 0, 1, 1], [], []>} : vector<16x32xf32>, vector<32x512xf32>, vector<16x512xf32> -> vector<16x512xf32>
    %61 = arith.addf %57, %60 : vector<16x512xf32>
    %c6 = arith.constant 6 : index
    %c0_59 = arith.constant 0 : index
    %c0_60 = arith.constant 0 : index
    %62 = vector.load %arg1[%c6, %c0_59, %c0_60] : memref<8x32x512xf32, #tpu.memory_space<vmem>>, vector<1x32x512xf32>
    %63 = vector.shape_cast %62 : vector<1x32x512xf32> to vector<32x512xf32>
    %cst_61 = arith.constant dense<0.000000e+00> : vector<16x512xf32>
    %64 = tpu.matmul %5, %63, %cst_61 {dimension_numbers = #tpu.dot_dimension_numbers<[1], [0], [0], [1], [0, 0, 1, 1], [], []>} : vector<16x32xf32>, vector<32x512xf32>, vector<16x512xf32> -> vector<16x512xf32>
    %65 = arith.addf %61, %64 : vector<16x512xf32>
    %66 = arith.minimumf %54, %65 : vector<16x512xf32>
    %c5_62 = arith.constant 5 : index
    %c0_63 = arith.constant 0 : index
    %c0_64 = arith.constant 0 : index
    %67 = vector.load %arg1[%c5_62, %c0_63, %c0_64] : memref<8x32x512xf32, #tpu.memory_space<vmem>>, vector<1x32x512xf32>
    %68 = vector.shape_cast %67 : vector<1x32x512xf32> to vector<32x512xf32>
    %cst_65 = arith.constant dense<0.000000e+00> : vector<16x512xf32>
    %69 = tpu.matmul %1, %68, %cst_65 {dimension_numbers = #tpu.dot_dimension_numbers<[1], [0], [0], [1], [0, 0, 1, 1], [], []>} : vector<16x32xf32>, vector<32x512xf32>, vector<16x512xf32> -> vector<16x512xf32>
    %c6_66 = arith.constant 6 : index
    %c0_67 = arith.constant 0 : index
    %c0_68 = arith.constant 0 : index
    %70 = vector.load %arg1[%c6_66, %c0_67, %c0_68] : memref<8x32x512xf32, #tpu.memory_space<vmem>>, vector<1x32x512xf32>
    %71 = vector.shape_cast %70 : vector<1x32x512xf32> to vector<32x512xf32>
    %cst_69 = arith.constant dense<0.000000e+00> : vector<16x512xf32>
    %72 = tpu.matmul %3, %71, %cst_69 {dimension_numbers = #tpu.dot_dimension_numbers<[1], [0], [0], [1], [0, 0, 1, 1], [], []>} : vector<16x32xf32>, vector<32x512xf32>, vector<16x512xf32> -> vector<16x512xf32>
    %73 = arith.addf %69, %72 : vector<16x512xf32>
    %c7 = arith.constant 7 : index
    %c0_70 = arith.constant 0 : index
    %c0_71 = arith.constant 0 : index
    %74 = vector.load %arg1[%c7, %c0_70, %c0_71] : memref<8x32x512xf32, #tpu.memory_space<vmem>>, vector<1x32x512xf32>
    %75 = vector.shape_cast %74 : vector<1x32x512xf32> to vector<32x512xf32>
    %cst_72 = arith.constant dense<0.000000e+00> : vector<16x512xf32>
    %76 = tpu.matmul %5, %75, %cst_72 {dimension_numbers = #tpu.dot_dimension_numbers<[1], [0], [0], [1], [0, 0, 1, 1], [], []>} : vector<16x32xf32>, vector<32x512xf32>, vector<16x512xf32> -> vector<16x512xf32>
    %77 = arith.addf %73, %76 : vector<16x512xf32>
    %78 = arith.minimumf %66, %77 : vector<16x512xf32>
    %c0_73 = arith.constant 0 : index
    %c0_74 = arith.constant 0 : index
    %79 = vector.load %arg3[%c0_73, %c0_74] : memref<16x1xf32, #tpu.memory_space<vmem>>, vector<16x1xf32>
    %80 = vector.broadcast %79 : vector<16x1xf32> to vector<16x512xf32>
    %81 = arith.addf %78, %80 : vector<16x512xf32>
    %cst_75 = arith.constant dense<0xFF800000> : vector<512xf32>
    %82 = vector.multi_reduction <maximumf>, %81, %cst_75 [0] : vector<16x512xf32> to vector<512xf32>
    %83 = vector.shape_cast %82 : vector<512xf32> to vector<1x512xf32>
    %84 = vector.broadcast %83 : vector<1x512xf32> to vector<16x512xf32>
    %85 = arith.subf %81, %84 : vector<16x512xf32>
    %86 = math.exp %85 : vector<16x512xf32>
    %cst_76 = arith.constant dense<0.000000e+00> : vector<512xf32>
    %87 = vector.multi_reduction <add>, %86, %cst_76 [0] : vector<16x512xf32> to vector<512xf32>
    %88 = vector.shape_cast %87 : vector<512xf32> to vector<1x512xf32>
    %cst_77 = arith.constant 1.000000e+00 : f32
    %89 = vector.broadcast %cst_77 : f32 to vector<1x512xf32>
    %90 = arith.divf %89, %88 : vector<1x512xf32>
    %91 = vector.broadcast %90 : vector<1x512xf32> to vector<16x512xf32>
    %92 = arith.mulf %86, %91 : vector<16x512xf32>
    %c0_78 = arith.constant 0 : index
    %c0_79 = arith.constant 0 : index
    %93 = vector.load %arg4[%c0_78, %c0_79] : memref<16x512xf32, #tpu.memory_space<vmem>>, vector<16x512xf32>
    tpu.vector_store %arg4[%c0_78, %c0_79], %92 {strides = array<i32>} : memref<16x512xf32, #tpu.memory_space<vmem>>, vector<16x512xf32>,
    return
  }
  func.func @transform_0(%arg0: i32) -> (i32, i32, i32) {
    %c0_i32 = arith.constant 0 : i32
    %c0_i32_0 = arith.constant 0 : i32
    %c0_i32_1 = arith.constant 0 : i32
    %c0_i32_2 = arith.constant 0 : i32
    return %c0_i32, %c0_i32_0, %c0_i32_1 : i32, i32, i32
  }
  func.func @transform_1(%arg0: i32) -> (i32, i32, i32) {
    %c0_i32 = arith.constant 0 : i32
    %c0_i32_0 = arith.constant 0 : i32
    %c0_i32_1 = arith.constant 0 : i32
    %c0_i32_2 = arith.constant 0 : i32
    return %c0_i32, %c0_i32_0, %c0_i32_1 : i32, i32, i32
  }
  func.func @transform_2(%arg0: i32) -> (i32, i32) {
    %c0_i32 = arith.constant 0 : i32
    %c0_i32_0 = arith.constant 0 : i32
    %c0_i32_1 = arith.constant 0 : i32
    return %c0_i32, %c0_i32_0 : i32, i32
  }
  func.func @transform_3(%arg0: i32) -> (i32, i32) {
    %c0_i32 = arith.constant 0 : i32
    %c0_i32_0 = arith.constant 0 : i32
    %c0_i32_1 = arith.constant 0 : i32
    return %c0_i32, %c0_i32_0 : i32, i32
  }
}

</mosaic_0001>

<bundles_post_ra>
// kernel: conv3d_min_softmax.1
= control target key start
LH: loop header
LB: loop body
LE: loop exit
PB: predicated region body
PF: predicated region fallthrough
CT: control target
= control target key end

     0   :  { %v3763_v3 = vmov 0.0   ;;  %vm55_vm0 = vcmask 261120   ;;  %s4637_s0 = inlined_call_operand.vmem [shape: f32[8,32,512], index: 0, kind: input, shape index: {}]   ;;  %s4638_s1 = inlined_call_operand.vmem [shape: f32[3,16,32], index: 1, kind: input, shape index: {}]   ;;  %s4639_s2 = inlined_call_operand.vmem [shape: f32[16,1], index: 2, kind: input, shape index: {}]   ;;  %s4640_s3 = inlined_call_operand.vmem [shape: f32[16,512], index: 3, kind: output, shape index: {}]  }
   0x1   :  { %v3169_v0 = vld [vmem:[%s4637_s0 + $0x88] sm:$0xff]  ;;  %v3171_v2 = vld [vmem:[%s4637_s0 + $0x98] sm:$0xff]  ;;  %126 = vmatprep.mubr.f32.mxu0 %v3763_v3  ;;  %203 = vmatprep.mubr.f32.mxu1 %v3763_v3  ;;  %v3168_v6 = vld [vmem:[%s4637_s0 + $0x80] sm:$0xff] }
   0x2   :  { %v3173_v1 = vld [vmem:[%s4637_s0 + $0xa8] sm:$0xff]  ;;  %v3175_v5 = vld [vmem:[%s4637_s0 + $0xb8] sm:$0xff]  ;;  %v3172_v7 = vld [vmem:[%s4637_s0 + $0xa0] sm:$0xff] }
   0x3   :  { %v3796_v4 = vpack.c.bf16 %v3173_v1, %v3169_v0  ;;  %v3807_v8 = vpack.c.bf16 %v3175_v5, %v3171_v2  ;;  %v3809_v9 = vpack.c.bf16 %v3172_v7, %v3168_v6  ;;  %v3170_v10 = vld [vmem:[%s4637_s0 + $0x90] sm:$0xff]  ;;  %v3177_v12 = vld [vmem:[%s4637_s0 + $0xc8] sm:$0xff]  ;;  %v3179_v15 = vld [vmem:[%s4637_s0 + $0xd8] sm:$0xff] }
   0x4   :  { %v3174_v11 = vld [vmem:[%s4637_s0 + $0xb0] sm:$0xff]  ;;  %v3181_v14 = vld [vmem:[%s4637_s0 + $0xe8] sm:$0xff]  ;;  %v3183_v16 = vld [vmem:[%s4637_s0 + $0xf8] sm:$0xff] }
   0x5   :  { %3353 = vmatprep.subr.bf16.mxu0 %v3796_v4  ;;  %v3821_v13 = vpack.c.bf16 %v3174_v11, %v3170_v10  ;;  %3361 = vmatprep.subr.bf16.mxu1 %v3807_v8  ;;  %v3834_v17 = vpack.c.bf16 %v3181_v14, %v3177_v12  ;;  %v3836_v18 = vpack.c.bf16 %v3183_v16, %v3179_v15  ;;  %v3176_v19 = vld [vmem:[%s4637_s0 + $0xc0] sm:$0xff]  ;;  %v3178_v21 = vld [vmem:[%s4637_s0 + $0xd0] sm:$0xff]  ;;  %v23_v24 = vld [vmem:[%s4637_s0 + $0x8] sm:$0xff] }
   0x6   :  { %3355 = vmatpush1.bf16.msra.mxu0 %v3809_v9  ;;  %v3180_v20 = vld [vmem:[%s4637_s0 + $0xe0] sm:$0xff]  ;;  %v3182_v23 = vld [vmem:[%s4637_s0 + $0xf0] sm:$0xff]  ;;  %v27_v26 = vld [vmem:[%s4637_s0 + $0x28] sm:$0xff] }
   0x7   :  { %3363 = vmatpush1.bf16.msra.mxu1 %v3821_v13  ;;  %v3848_v22 = vpack.c.bf16 %v3180_v20, %v3176_v19  ;;  %3357 = vmatprep.subr.bf16.mxu0 %v3834_v17  ;;  %v3858_v25 = vpack.c.bf16 %v3182_v23, %v3178_v21  ;;  %v25_v27 = vld [vmem:[%s4637_s0 + $0x18] sm:$0xff]  ;;  %v3368_v29 = vpack.c.bf16 %v27_v26, %v23_v24  ;;  %v22_v31 = vld [vmem:[%s4637_s0] sm:$0xff]  ;;  %v24_v33 = vld [vmem:[%s4637_s0 + $0x10] sm:$0xff] }
   0x8   :  { %3365 = vmatprep.subr.bf16.mxu1 %v3836_v18  ;;  %v29_v28 = vld [vmem:[%s4637_s0 + $0x38] sm:$0xff]  ;;  %v26_v32 = vld [vmem:[%s4637_s0 + $0x20] sm:$0xff]  ;;  %v3882_v34 = vld [vmem:[%s4638_s1 + $0x10] sm:$0xff] }
   0x9   :  { %v3376_v30 = vpack.c.bf16 %v29_v28, %v25_v27  ;;  %v3370_v35 = vpack.c.bf16 %v26_v32, %v22_v31  ;;  %v28_v36 = vld [vmem:[%s4637_s0 + $0x30] sm:$0xff]  ;;  %v31_v37 = vld [vmem:[%s4637_s0 + $0x48] sm:$0xff]  ;;  %v33_v40 = vld [vmem:[%s4637_s0 + $0x58] sm:$0xff] }
   0xa   :  { %3359 = vmatpush1.bf16.msra.mxu0 %v3848_v22  ;;  %v3378_v38 = vpack.c.bf16 %v28_v36, %v24_v33  ;;  %v35_v39 = vld [vmem:[%s4637_s0 + $0x68] sm:$0xff]  ;;  %v37_v41 = vld [vmem:[%s4637_s0 + $0x78] sm:$0xff]  ;;  %v30_v43 = vld [vmem:[%s4637_s0 + $0x40] sm:$0xff] }
   0xb   :  { %3367 = vmatpush1.bf16.msra.mxu1 %v3858_v25  ;;  %3369 = vmatprep.subr.bf16.mxu0 %v3368_v29  ;;  %v3372_v42 = vpack.c.bf16 %v35_v39, %v31_v37  ;;  %v34_v44 = vld [vmem:[%s4637_s0 + $0x60] sm:$0xff]  ;;  %v32_v45 = vld [vmem:[%s4637_s0 + $0x50] sm:$0xff]  ;;  %v3914_v46 = vld [vmem:[%s4638_s1 + $0x18] sm:$0xff]  ;;  %v3380_v47 = vpack.c.bf16 %v37_v41, %v33_v40 }
   0xc   :  { %3377 = vmatprep.subr.bf16.mxu1 %v3376_v30  ;;  %v36_v48 = vld [vmem:[%s4637_s0 + $0x70] sm:$0xff]  ;;  %v3193_v49 = vld [vmem:[%s4637_s0 + $0x108] sm:$0xff]  ;;  %v3374_v50 = vpack.c.bf16 %v34_v44, %v30_v43  ;;  %v3195_v52 = vld [vmem:[%s4637_s0 + $0x118] sm:$0xff] }
   0xd   :  { %3184 = vmatmul.mubr.msk.f32.vlgmr.msra.gmra.mrb[0].mxu0 %vm55_vm0, %v3882_v34  ;;  %v3197_v51 = vld [vmem:[%s4637_s0 + $0x128] sm:$0xff]  ;;  %v3199_v53 = vld [vmem:[%s4637_s0 + $0x138] sm:$0xff]  ;;  %v3382_v54 = vpack.c.bf16 %v36_v48, %v32_v45  ;;  %v3192_v55 = vld [vmem:[%s4637_s0 + $0x100] sm:$0xff] }
   0xe   :  { %3186 = vmatmul.mubr.msk.f32.vlgmr.msra.gmra.mrb[0].mxu1 %vm55_vm0, %v3882_v34  ;;  %3371 = vmatpush1.bf16.msra.mxu0 %v3370_v35  ;;  %v3196_v56 = vld [vmem:[%s4637_s0 + $0x120] sm:$0xff]  ;;  %v3941_v57 = vpack.c.bf16 %v3197_v51, %v3193_v49  ;;  %v3194_v58 = vld [vmem:[%s4637_s0 + $0x110] sm:$0xff]  ;;  %v3951_v60 = vpack.c.bf16 %v3199_v53, %v3195_v52  ;;  %v3201_v61 = vld [vmem:[%s4637_s0 + $0x148] sm:$0xff] }
   0xf   :  { %3379 = vmatpush1.bf16.msra.mxu1 %v3378_v38  ;;  %132 = vmatprep.mubr.f32.mxu0 %v3763_v3  ;;  %v3198_v59 = vld [vmem:[%s4637_s0 + $0x130] sm:$0xff]  ;;  %v3205_v62 = vld [vmem:[%s4637_s0 + $0x168] sm:$0xff]  ;;  %v3964_v63 = vld [vmem:[%s4638_s1] sm:$0xff]  ;;  %v3966_v0 = vpack.c.bf16 %v3196_v56, %v3192_v55 }
  0x10   :  { %209 = vmatprep.mubr.f32.mxu1 %v3763_v3  ;;  %3373 = vmatprep.subr.bf16.mxu0 %v3372_v42  ;;  %v3203_v1 = vld [vmem:[%s4637_s0 + $0x158] sm:$0xff]  ;;  %v3975_v5 = vpack.c.bf16 %v3198_v59, %v3194_v58  ;;  %v3200_v6 = vld [vmem:[%s4637_s0 + $0x140] sm:$0xff]  ;;  %v3985_v10 = vpack.c.bf16 %v3205_v62, %v3201_v61  ;;  %v3202_v11 = vld [vmem:[%s4637_s0 + $0x150] sm:$0xff] }
  0x11   :  { %3185 = vmatmul.mubr.msk.f32.gmra.mrb[2].mxu0 %vm55_vm0, %v3914_v46  ;;  %3381 = vmatprep.subr.bf16.mxu1 %v3380_v47  ;;  %v3207_v2 = vld [vmem:[%s4637_s0 + $0x178] sm:$0xff]  ;;  %v3204_v7 = vld [vmem:[%s4637_s0 + $0x160] sm:$0xff]  ;;  %v3206_v12 = vld [vmem:[%s4637_s0 + $0x170] sm:$0xff] }
  0x12   :  { %3187 = vmatmul.mubr.msk.f32.gmra.mrb[2].mxu1 %vm55_vm0, %v3914_v46  ;;  %3375 = vmatpush1.bf16.msra.mxu0 %v3374_v50  ;;  %v3996_v14 = vpack.c.bf16 %v3207_v2, %v3203_v1  ;;  %v4004_v15 = vld [vmem:[%s4638_s1 + $0x8] sm:$0xff]  ;;  %v4006_v16 = vpack.c.bf16 %v3204_v7, %v3200_v6  ;;  %v4010_v19 = vpack.c.bf16 %v3206_v12, %v3202_v11  ;;  %v4023_v20 = vld [vmem:[%s4638_s1 + $0x20] sm:$0xff]  ;;  %v3226_v28 = vld [vmem:[%s4637_s0 + $0x1b0] sm:$0xff] }
  0x13   :  { %3383 = vmatpush1.bf16.msra.mxu1 %v3382_v54  ;;  %286 = vmatprep.mubr.f32.mxu0 %v3763_v3  ;;  %v4038_v21 = vld [vmem:[%s4638_s1 + $0x28] sm:$0xff]  ;;  %v3220_v26 = vld [vmem:[%s4637_s0 + $0x180] sm:$0xff]  ;;  %v3235_v32 = vld [vmem:[%s4637_s0 + $0x1f8] sm:$0xff] }
  0x14   :  { %363 = vmatprep.mubr.f32.mxu1 %v3763_v3  ;;  %3385 = vmatprep.subr.bf16.mxu0 %v3941_v57  ;;  %v3221_v23 = vld [vmem:[%s4637_s0 + $0x188] sm:$0xff]  ;;  %v3232_v35 = vld [vmem:[%s4637_s0 + $0x1e0] sm:$0xff]  ;;  %v3234_v37 = vld [vmem:[%s4637_s0 + $0x1f0] sm:$0xff] }
  0x15   :  { %3188 = vmatmul.mubr.msk.f32.vlgmr.msra.gmra.mrb[0].mxu0 %vm55_vm0, %v3964_v63  ;;  %3393 = vmatprep.subr.bf16.mxu1 %v3951_v60  ;;  %v3225_v24 = vld [vmem:[%s4637_s0 + $0x1a8] sm:$0xff]  ;;  %v3251_v43 = vld [vmem:[%s4637_s0 + $0x218] sm:$0xff]  ;;  %v3248_v45 = vld [vmem:[%s4637_s0 + $0x200] sm:$0xff] }
  0x16   :  { %3190 = vmatmul.mubr.msk.f32.vlgmr.msra.gmra.mrb[0].mxu1 %vm55_vm0, %v3964_v63  ;;  %3387 = vmatpush1.bf16.msra.mxu0 %v3966_v0  ;;  %v4082_v27 = vpack.c.bf16 %v3225_v24, %v3221_v23  ;;  %v3233_v30 = vld [vmem:[%s4637_s0 + $0x1e8] sm:$0xff]  ;;  %v3255_v44 = vld [vmem:[%s4637_s0 + $0x238] sm:$0xff]  ;;  %v3252_v47 = vld [vmem:[%s4637_s0 + $0x220] sm:$0xff] }
  0x17   :  { %3395 = vmatpush1.bf16.msra.mxu1 %v3975_v5  ;;  %292 = vmatprep.mubr.f32.mxu0 %v3763_v3  ;;  %v3249_v41 = vld [vmem:[%s4637_s0 + $0x208] sm:$0xff]  ;;  %v3250_v49 = vld [vmem:[%s4637_s0 + $0x210] sm:$0xff]  ;;  %v4217_v51 = vpack.c.bf16 %v3255_v44, %v3251_v43  ;;  %v4228_v54 = vpack.c.bf16 %v3252_v47, %v3248_v45  ;;  %v3259_v55 = vld [vmem:[%s4637_s0 + $0x258] sm:$0xff] }
  0x18   :  { %369 = vmatprep.mubr.f32.mxu1 %v3763_v3  ;;  %3389 = vmatprep.subr.bf16.mxu0 %v3985_v10  ;;  %v3253_v42 = vld [vmem:[%s4637_s0 + $0x228] sm:$0xff]  ;;  %v3254_v50 = vld [vmem:[%s4637_s0 + $0x230] sm:$0xff]  ;;  %v3263_v56 = vld [vmem:[%s4637_s0 + $0x278] sm:$0xff] }
  0x19   :  { %3189 = vmatmul.mubr.msk.f32.gmra.mrb[2].mxu0 %vm55_vm0, %v4004_v15  ;;  %3397 = vmatprep.subr.bf16.mxu1 %v3996_v14  ;;  %v4206_v48 = vpack.c.bf16 %v3253_v42, %v3249_v41  ;;  %v3257_v52 = vld [vmem:[%s4637_s0 + $0x248] sm:$0xff]  ;;  %v3256_v58 = vld [vmem:[%s4637_s0 + $0x240] sm:$0xff]  ;;  %v3258_v61 = vld [vmem:[%s4637_s0 + $0x250] sm:$0xff] }
  0x1a   :  { %3191 = vmatmul.mubr.msk.f32.gmra.mrb[2].mxu1 %vm55_vm0, %v4004_v15  ;;  %3391 = vmatpush1.bf16.msra.mxu0 %v4006_v16  ;;  %v3261_v53 = vld [vmem:[%s4637_s0 + $0x268] sm:$0xff]  ;;  %v3260_v59 = vld [vmem:[%s4637_s0 + $0x260] sm:$0xff]  ;;  %v3262_v62 = vld [vmem:[%s4637_s0 + $0x270] sm:$0xff] }
  0x1b   :  { %3399 = vmatpush1.bf16.msra.mxu1 %v4010_v19  ;;  %463 = vmatprep.mubr.f32.mxu0 %v3763_v3  ;;  %v4264_v1 = vpack.c.bf16 %v3260_v59, %v3256_v58  ;;  %v4268_v2 = vpack.c.bf16 %v3262_v62, %v3258_v61  ;;  %v3281_v6 = vld [vmem:[%s4637_s0 + $0x2a8] sm:$0xff]  ;;  %v3279_v7 = vld [vmem:[%s4637_s0 + $0x298] sm:$0xff]  ;;  %v3276_v11 = vld [vmem:[%s4637_s0 + $0x280] sm:$0xff] }
  0x1c   :  { %540 = vmatprep.mubr.f32.mxu1 %v3763_v3  ;;  %3401 = vmatprep.subr.bf16.mxu0 %v3941_v57  ;;  %v3280_v12 = vld [vmem:[%s4637_s0 + $0x2a0] sm:$0xff]  ;;  %v3285_v24 = vld [vmem:[%s4637_s0 + $0x2c8] sm:$0xff]  ;;  %v3315_v45 = vld [vmem:[%s4637_s0 + $0x358] sm:$0xff] }
  0x1d   :  { %3208 = vmatmul.mubr.msk.f32.vlgmr.msra.gmra.mrb[0].mxu0 %vm55_vm0, %v4023_v20  ;;  %3409 = vmatprep.subr.bf16.mxu1 %v3951_v60  ;;  %v3313_v42 = vld [vmem:[%s4637_s0 + $0x348] sm:$0xff]  ;;  %v3319_v47 = vld [vmem:[%s4637_s0 + $0x378] sm:$0xff]  ;;  %v3332_v61 = vld [vmem:[%s4637_s0 + $0x380] sm:$0xff] }
  0x1e   :  { %3210 = vmatmul.mubr.msk.f32.vlgmr.msra.gmra.mrb[0].mxu1 %vm55_vm0, %v4023_v20  ;;  %3403 = vmatpush1.bf16.msra.mxu0 %v3966_v0  ;;  %v3317_v43 = vld [vmem:[%s4637_s0 + $0x368] sm:$0xff]  ;;  %v3335_v59 = vld [vmem:[%s4637_s0 + $0x398] sm:$0xff] }
  0x1f   :  { %3411 = vmatpush1.bf16.msra.mxu1 %v3975_v5  ;;  %469 = vmatprep.mubr.f32.mxu0 %v3763_v3  ;;  %v3337_v58 = vld [vmem:[%s4637_s0 + $0x3a8] sm:$0xff] }
  0x20   :  { %546 = vmatprep.mubr.f32.mxu1 %v3763_v3  ;;  %3405 = vmatprep.subr.bf16.mxu0 %v3985_v10 }
  0x21   :  { %3209 = vmatmul.mubr.msk.f32.gmra.mrb[2].mxu0 %vm55_vm0, %v4038_v21  ;;  %3413 = vmatprep.subr.bf16.mxu1 %v3996_v14 }
  0x22   :  { %3211 = vmatmul.mubr.msk.f32.gmra.mrb[2].mxu1 %vm55_vm0, %v4038_v21  ;;  %3407 = vmatpush1.bf16.msra.mxu0 %v4006_v16 }
  0x23   :  { %3415 = vmatpush1.bf16.msra.mxu1 %v4010_v19  ;;  %625 = vmatprep.mubr.f32.mxu0 %v3763_v3 }
  0x24   :  { %702 = vmatprep.mubr.f32.mxu1 %v3763_v3  ;;  %3417 = vmatprep.subr.bf16.mxu0 %v3796_v4  ;;  %v3223_v4 = vld [vmem:[%s4637_s0 + $0x198] sm:$0xff] }
  0x25   :  { %3212 = vmatmul.mubr.msk.f32.vlgmr.msra.gmra.mrb[4].mxu0 %vm55_vm0, %v3882_v34  ;;  %3425 = vmatprep.subr.bf16.mxu1 %v3807_v8  ;;  %v3227_v8 = vld [vmem:[%s4637_s0 + $0x1b8] sm:$0xff] }
  0x26   :  { %3214 = vmatmul.mubr.msk.f32.vlgmr.msra.gmra.mrb[4].mxu1 %vm55_vm0, %v3882_v34  ;;  %3419 = vmatpush1.bf16.msra.mxu0 %v3809_v9  ;;  %v3224_v9 = vld [vmem:[%s4637_s0 + $0x1a0] sm:$0xff]  ;;  %v4093_v29 = vpack.c.bf16 %v3227_v8, %v3223_v4  ;;  %v3289_v4 = vld [vmem:[%s4637_s0 + $0x2e8] sm:$0xff]  ;;  %v4352_v8 = vpack.c.bf16 %v3280_v12, %v3276_v11  ;;  %v3347_v11 = vld [vmem:[%s4637_s0 + $0x3f8] sm:$0xff] }
  0x27   :  { %3427 = vmatpush1.bf16.msra.mxu1 %v3821_v13  ;;  %631 = vmatprep.mubr.f32.mxu0 %v3763_v3  ;;  %v3222_v13 = vld [vmem:[%s4637_s0 + $0x190] sm:$0xff]  ;;  %v4104_v31 = vpack.c.bf16 %v3224_v9, %v3220_v26  ;;  %v3287_v26 = vld [vmem:[%s4637_s0 + $0x2d8] sm:$0xff] }
  0x28   :  { %708 = vmatprep.mubr.f32.mxu1 %v3763_v3  ;;  %3421 = vmatprep.subr.bf16.mxu0 %v3834_v17  ;;  %v3229_v17 = vld [vmem:[%s4637_s0 + $0x1c8] sm:$0xff]  ;;  %v4114_v33 = vpack.c.bf16 %v3226_v28, %v3222_v13  ;;  %v3291_v9 = vld [vmem:[%s4637_s0 + $0x2f8] sm:$0xff]  ;;  %v3284_v13 = vld [vmem:[%s4637_s0 + $0x2c0] sm:$0xff] }
  0x29   :  { %3213 = vmatmul.mubr.msk.f32.gmra.mrb[6].mxu0 %vm55_vm0, %v3914_v46  ;;  %3429 = vmatprep.subr.bf16.mxu1 %v3836_v18  ;;  %v3231_v18 = vld [vmem:[%s4637_s0 + $0x1d8] sm:$0xff]  ;;  %v4124_v36 = vpack.c.bf16 %v3233_v30, %v3229_v17  ;;  %v3288_v28 = vld [vmem:[%s4637_s0 + $0x2e0] sm:$0xff]  ;;  %v3286_v17 = vld [vmem:[%s4637_s0 + $0x2d0] sm:$0xff] }
  0x2a   :  { %3215 = vmatmul.mubr.msk.f32.gmra.mrb[6].mxu1 %vm55_vm0, %v3914_v46  ;;  %3423 = vmatpush1.bf16.msra.mxu0 %v3848_v22  ;;  %v3228_v22 = vld [vmem:[%s4637_s0 + $0x1c0] sm:$0xff]  ;;  %v4135_v38 = vpack.c.bf16 %v3235_v32, %v3231_v18  ;;  %v3290_v30 = vld [vmem:[%s4637_s0 + $0x2f0] sm:$0xff]  ;;  %v4388_v18 = vpack.c.bf16 %v3288_v28, %v3284_v13 }
  0x2b   :  { %3431 = vmatpush1.bf16.msra.mxu1 %v3858_v25  ;;  %779 = vmatprep.mubr.f32.mxu0 %v3763_v3  ;;  %v3230_v25 = vld [vmem:[%s4637_s0 + $0x1d0] sm:$0xff]  ;;  %v4140_v39 = vpack.c.bf16 %v3232_v35, %v3228_v22  ;;  %v4392_v32 = vpack.c.bf16 %v3290_v30, %v3286_v17  ;;  %v3309_v22 = vld [vmem:[%s4637_s0 + $0x328] sm:$0xff]  ;;  %v3307_v35 = vld [vmem:[%s4637_s0 + $0x318] sm:$0xff] }
  0x2c   :  { %856 = vmatprep.mubr.f32.mxu1 %v3763_v3  ;;  %3433 = vmatprep.subr.bf16.mxu0 %v4082_v27  ;;  %v4144_v40 = vpack.c.bf16 %v3234_v37, %v3230_v25  ;;  %v3304_v25 = vld [vmem:[%s4637_s0 + $0x300] sm:$0xff] }
  0x2d   :  { %3216 = vmatmul.mubr.msk.f32.vlgmr.msra.gmra.mrb[4].mxu0 %vm55_vm0, %v3964_v63  ;;  %3441 = vmatprep.subr.bf16.mxu1 %v4093_v29  ;;  %v3308_v37 = vld [vmem:[%s4637_s0 + $0x320] sm:$0xff] }
  0x2e   :  { %3218 = vmatmul.mubr.msk.f32.vlgmr.msra.gmra.mrb[4].mxu1 %vm55_vm0, %v3964_v63  ;;  %3435 = vmatpush1.bf16.msra.mxu0 %v4104_v31  ;;  %v3578_v44 = vpack.c.bf16 %v3308_v37, %v3304_v25 }
  0x2f   :  { %3443 = vmatpush1.bf16.msra.mxu1 %v4114_v33  ;;  %785 = vmatprep.mubr.f32.mxu0 %v3763_v3 }
  0x30   :  { %862 = vmatprep.mubr.f32.mxu1 %v3763_v3  ;;  %3437 = vmatprep.subr.bf16.mxu0 %v4124_v36 }
  0x31   :  { %3217 = vmatmul.mubr.msk.f32.gmra.mrb[6].mxu0 %vm55_vm0, %v4004_v15  ;;  %3445 = vmatprep.subr.bf16.mxu1 %v4135_v38 }
  0x32   :  { %3219 = vmatmul.mubr.msk.f32.gmra.mrb[6].mxu1 %vm55_vm0, %v4004_v15  ;;  %3439 = vmatpush1.bf16.msra.mxu0 %v4140_v39 }
  0x33   :  { %3447 = vmatpush1.bf16.msra.mxu1 %v4144_v40  ;;  %950 = vmatprep.mubr.f32.mxu0 %v3763_v3 }
  0x34   :  { %1027 = vmatprep.mubr.f32.mxu1 %v3763_v3  ;;  %3449 = vmatprep.subr.bf16.mxu0 %v4082_v27 }
  0x35   :  { %3236 = vmatmul.mubr.msk.f32.vlgmr.msra.gmra.mrb[4].mxu0 %vm55_vm0, %v4023_v20  ;;  %3457 = vmatprep.subr.bf16.mxu1 %v4093_v29 }
  0x36   :  { %3238 = vmatmul.mubr.msk.f32.vlgmr.msra.gmra.mrb[4].mxu1 %vm55_vm0, %v4023_v20  ;;  %3451 = vmatpush1.bf16.msra.mxu0 %v4104_v31 }
  0x37   :  { %3459 = vmatpush1.bf16.msra.mxu1 %v4114_v33  ;;  %956 = vmatprep.mubr.f32.mxu0 %v3763_v3 }
  0x38   :  { %1033 = vmatprep.mubr.f32.mxu1 %v3763_v3  ;;  %3453 = vmatprep.subr.bf16.mxu0 %v4124_v36 }
  0x39   :  { %3237 = vmatmul.mubr.msk.f32.gmra.mrb[6].mxu0 %vm55_vm0, %v4038_v21  ;;  %3461 = vmatprep.subr.bf16.mxu1 %v4135_v38 }
  0x3a   :  { %3239 = vmatmul.mubr.msk.f32.gmra.mrb[6].mxu1 %vm55_vm0, %v4038_v21  ;;  %3455 = vmatpush1.bf16.msra.mxu0 %v4140_v39 }
  0x3b   :  { %3463 = vmatpush1.bf16.msra.mxu1 %v4144_v40  ;;  %1120 = vmatprep.mubr.f32.mxu0 %v3763_v3 }
  0x3c   :  { %1197 = vmatprep.mubr.f32.mxu1 %v3763_v3  ;;  %3465 = vmatprep.subr.bf16.mxu0 %v3941_v57  ;;  %v4238_v57 = vpack.c.bf16 %v3254_v50, %v3250_v49  ;;  %v3312_v49 = vld [vmem:[%s4637_s0 + $0x340] sm:$0xff] }
  0x3d   :  { %3240 = vmatmul.mubr.msk.f32.vlgmr.msra.gmra.mrb[8].mxu0 %vm55_vm0, %v3882_v34  ;;  %3473 = vmatprep.subr.bf16.mxu1 %v3951_v60  ;;  %v4248_v60 = vpack.c.bf16 %v3261_v53, %v3257_v52  ;;  %v3316_v50 = vld [vmem:[%s4637_s0 + $0x360] sm:$0xff]  ;;  %v3314_v52 = vld [vmem:[%s4637_s0 + $0x350] sm:$0xff] }
  0x3e   :  { %3242 = vmatmul.mubr.msk.f32.vlgmr.msra.gmra.mrb[8].mxu1 %vm55_vm0, %v3882_v34  ;;  %3467 = vmatpush1.bf16.msra.mxu0 %v3966_v0  ;;  %v4259_v0 = vpack.c.bf16 %v3263_v56, %v3259_v55  ;;  %v3318_v53 = vld [vmem:[%s4637_s0 + $0x370] sm:$0xff]  ;;  %v3582_v55 = vpack.c.bf16 %v3316_v50, %v3312_v49 }
  0x3f   :  { %3475 = vmatpush1.bf16.msra.mxu1 %v3975_v5  ;;  %1126 = vmatprep.mubr.f32.mxu0 %v3763_v3  ;;  %v3277_v5 = vld [vmem:[%s4637_s0 + $0x288] sm:$0xff]  ;;  %v3590_v56 = vpack.c.bf16 %v3318_v53, %v3314_v52 }
  0x40   :  { %1203 = vmatprep.mubr.f32.mxu1 %v3763_v3  ;;  %3469 = vmatprep.subr.bf16.mxu0 %v3985_v10  ;;  %v3283_v10 = vld [vmem:[%s4637_s0 + $0x2b8] sm:$0xff] }
  0x41   :  { %3241 = vmatmul.mubr.msk.f32.gmra.mrb[10].mxu0 %vm55_vm0, %v3914_v46  ;;  %3477 = vmatprep.subr.bf16.mxu1 %v3996_v14  ;;  %v4330_v14 = vpack.c.bf16 %v3281_v6, %v3277_v5  ;;  %v4341_v23 = vpack.c.bf16 %v3283_v10, %v3279_v7  ;;  %v3341_v5 = vld [vmem:[%s4637_s0 + $0x3c8] sm:$0xff]  ;;  %v3343_v10 = vld [vmem:[%s4637_s0 + $0x3d8] sm:$0xff] }
  0x42   :  { %3243 = vmatmul.mubr.msk.f32.gmra.mrb[10].mxu1 %vm55_vm0, %v3914_v46  ;;  %3471 = vmatpush1.bf16.msra.mxu0 %v4006_v16  ;;  %v3278_v16 = vld [vmem:[%s4637_s0 + $0x290] sm:$0xff]  ;;  %v3345_v6 = vld [vmem:[%s4637_s0 + $0x3e8] sm:$0xff] }
  0x43   :  { %3479 = vmatpush1.bf16.msra.mxu1 %v4010_v19  ;;  %1274 = vmatprep.mubr.f32.mxu0 %v3763_v3  ;;  %v3282_v19 = vld [vmem:[%s4637_s0 + $0x2b0] sm:$0xff] }
  0x44   :  { %1351 = vmatprep.mubr.f32.mxu1 %v3763_v3  ;;  %3481 = vmatprep.subr.bf16.mxu0 %v4206_v48 }
  0x45   :  { %3244 = vmatmul.mubr.msk.f32.vlgmr.msra.gmra.mrb[8].mxu0 %vm55_vm0, %v3964_v63  ;;  %3489 = vmatprep.subr.bf16.mxu1 %v4217_v51 }
  0x46   :  { %3246 = vmatmul.mubr.msk.f32.vlgmr.msra.gmra.mrb[8].mxu1 %vm55_vm0, %v3964_v63  ;;  %3483 = vmatpush1.bf16.msra.mxu0 %v4228_v54 }
  0x47   :  { %3491 = vmatpush1.bf16.msra.mxu1 %v4238_v57  ;;  %1280 = vmatprep.mubr.f32.mxu0 %v3763_v3 }
  0x48   :  { %1357 = vmatprep.mubr.f32.mxu1 %v3763_v3  ;;  %3485 = vmatprep.subr.bf16.mxu0 %v4248_v60 }
  0x49   :  { %3245 = vmatmul.mubr.msk.f32.gmra.mrb[10].mxu0 %vm55_vm0, %v4004_v15  ;;  %3493 = vmatprep.subr.bf16.mxu1 %v4259_v0 }
  0x4a   :  { %3247 = vmatmul.mubr.msk.f32.gmra.mrb[10].mxu1 %vm55_vm0, %v4004_v15  ;;  %3487 = vmatpush1.bf16.msra.mxu0 %v4264_v1 }
  0x4b   :  { %3495 = vmatpush1.bf16.msra.mxu1 %v4268_v2  ;;  %1445 = vmatprep.mubr.f32.mxu0 %v3763_v3 }
  0x4c   :  { %1522 = vmatprep.mubr.f32.mxu1 %v3763_v3  ;;  %3497 = vmatprep.subr.bf16.mxu0 %v4206_v48 }
  0x4d   :  { %3264 = vmatmul.mubr.msk.f32.vlgmr.msra.gmra.mrb[8].mxu0 %vm55_vm0, %v4023_v20  ;;  %3505 = vmatprep.subr.bf16.mxu1 %v4217_v51 }
  0x4e   :  { %3266 = vmatmul.mubr.msk.f32.vlgmr.msra.gmra.mrb[8].mxu1 %vm55_vm0, %v4023_v20  ;;  %3499 = vmatpush1.bf16.msra.mxu0 %v4228_v54 }
  0x4f   :  { %3507 = vmatpush1.bf16.msra.mxu1 %v4238_v57  ;;  %1451 = vmatprep.mubr.f32.mxu0 %v3763_v3 }
  0x50   :  { %1528 = vmatprep.mubr.f32.mxu1 %v3763_v3  ;;  %3501 = vmatprep.subr.bf16.mxu0 %v4248_v60 }
  0x51   :  { %3265 = vmatmul.mubr.msk.f32.gmra.mrb[10].mxu0 %vm55_vm0, %v4038_v21  ;;  %3509 = vmatprep.subr.bf16.mxu1 %v4259_v0 }
  0x52   :  { %3267 = vmatmul.mubr.msk.f32.gmra.mrb[10].mxu1 %vm55_vm0, %v4038_v21  ;;  %3503 = vmatpush1.bf16.msra.mxu0 %v4264_v1 }
  0x53   :  { %3511 = vmatpush1.bf16.msra.mxu1 %v4268_v2  ;;  %1615 = vmatprep.mubr.f32.mxu0 %v3763_v3 }
  0x54   :  { %1692 = vmatprep.mubr.f32.mxu1 %v3763_v3  ;;  %3513 = vmatprep.subr.bf16.mxu0 %v4082_v27  ;;  %v4362_v27 = vpack.c.bf16 %v3282_v19, %v3278_v16  ;;  %v3628_v16 = vpack.c.bf16 %v3345_v6, %v3341_v5  ;;  %v3342_v19 = vld [vmem:[%s4637_s0 + $0x3d0] sm:$0xff] }
  0x55   :  { %3268 = vmatmul.mubr.msk.f32.vlgmr.msra.gmra.mrb[12].mxu0 %vm55_vm0, %v3882_v34  ;;  %3521 = vmatprep.subr.bf16.mxu1 %v4093_v29  ;;  %v4372_v29 = vpack.c.bf16 %v3289_v4, %v3285_v24  ;;  %v3636_v24 = vpack.c.bf16 %v3347_v11, %v3343_v10 }
  0x56   :  { %3270 = vmatmul.mubr.msk.f32.vlgmr.msra.gmra.mrb[12].mxu1 %vm55_vm0, %v3882_v34  ;;  %3515 = vmatpush1.bf16.msra.mxu0 %v4104_v31  ;;  %v4383_v31 = vpack.c.bf16 %v3291_v9, %v3287_v26  ;;  %v3764_v26 = vmov 0  }
  0x57   :  { %3523 = vmatpush1.bf16.msra.mxu1 %v4114_v33  ;;  %1621 = vmatprep.mubr.f32.mxu0 %v3763_v3  ;;  %v3305_v33 = vld [vmem:[%s4637_s0 + $0x308] sm:$0xff] }
  0x58   :  { %1698 = vmatprep.mubr.f32.mxu1 %v3763_v3  ;;  %3517 = vmatprep.subr.bf16.mxu0 %v4124_v36  ;;  %v3311_v36 = vld [vmem:[%s4637_s0 + $0x338] sm:$0xff] }
  0x59   :  { %3269 = vmatmul.mubr.msk.f32.gmra.mrb[14].mxu0 %vm55_vm0, %v3914_v46  ;;  %3525 = vmatprep.subr.bf16.mxu1 %v4135_v38  ;;  %v3576_v38 = vpack.c.bf16 %v3309_v22, %v3305_v33  ;;  %v3584_v41 = vpack.c.bf16 %v3311_v36, %v3307_v35 }
  0x5a   :  { %3271 = vmatmul.mubr.msk.f32.gmra.mrb[14].mxu1 %vm55_vm0, %v3914_v46  ;;  %3519 = vmatpush1.bf16.msra.mxu0 %v4140_v39  ;;  %v3306_v39 = vld [vmem:[%s4637_s0 + $0x310] sm:$0xff] }
  0x5b   :  { %3527 = vmatpush1.bf16.msra.mxu1 %v4144_v40  ;;  %1769 = vmatprep.mubr.f32.mxu0 %v3763_v3  ;;  %v3310_v40 = vld [vmem:[%s4637_s0 + $0x330] sm:$0xff] }
  0x5c   :  { %1846 = vmatprep.mubr.f32.mxu1 %v3763_v3  ;;  %3529 = vmatprep.subr.bf16.mxu0 %v4330_v14 }
  0x5d   :  { %3272 = vmatmul.mubr.msk.f32.vlgmr.msra.gmra.mrb[12].mxu0 %vm55_vm0, %v3964_v63  ;;  %3537 = vmatprep.subr.bf16.mxu1 %v4341_v23 }
  0x5e   :  { %3274 = vmatmul.mubr.msk.f32.vlgmr.msra.gmra.mrb[12].mxu1 %vm55_vm0, %v3964_v63  ;;  %3531 = vmatpush1.bf16.msra.mxu0 %v4352_v8 }
  0x5f   :  { %3539 = vmatpush1.bf16.msra.mxu1 %v4362_v27  ;;  %1775 = vmatprep.mubr.f32.mxu0 %v3763_v3 }
  0x60   :  { %1852 = vmatprep.mubr.f32.mxu1 %v3763_v3  ;;  %3533 = vmatprep.subr.bf16.mxu0 %v4372_v29 }
  0x61   :  { %3273 = vmatmul.mubr.msk.f32.gmra.mrb[14].mxu0 %vm55_vm0, %v4004_v15  ;;  %3541 = vmatprep.subr.bf16.mxu1 %v4383_v31 }
  0x62   :  { %3275 = vmatmul.mubr.msk.f32.gmra.mrb[14].mxu1 %vm55_vm0, %v4004_v15  ;;  %3535 = vmatpush1.bf16.msra.mxu0 %v4388_v18 }
  0x63   :  { %3543 = vmatpush1.bf16.msra.mxu1 %v4392_v32  ;;  %1940 = vmatprep.mubr.f32.mxu0 %v3763_v3 }
  0x64   :  { %2017 = vmatprep.mubr.f32.mxu1 %v3763_v3  ;;  %3545 = vmatprep.subr.bf16.mxu0 %v4330_v14 }
  0x65   :  { %3292 = vmatmul.mubr.msk.f32.vlgmr.msra.gmra.mrb[12].mxu0 %vm55_vm0, %v4023_v20  ;;  %3553 = vmatprep.subr.bf16.mxu1 %v4341_v23 }
  0x66   :  { %3294 = vmatmul.mubr.msk.f32.vlgmr.msra.gmra.mrb[12].mxu1 %vm55_vm0, %v4023_v20  ;;  %3547 = vmatpush1.bf16.msra.mxu0 %v4352_v8 }
  0x67   :  { %3555 = vmatpush1.bf16.msra.mxu1 %v4362_v27  ;;  %1946 = vmatprep.mubr.f32.mxu0 %v3763_v3 }
  0x68   :  { %2023 = vmatprep.mubr.f32.mxu1 %v3763_v3  ;;  %3549 = vmatprep.subr.bf16.mxu0 %v4372_v29 }
  0x69   :  { %3293 = vmatmul.mubr.msk.f32.gmra.mrb[14].mxu0 %vm55_vm0, %v4038_v21  ;;  %3557 = vmatprep.subr.bf16.mxu1 %v4383_v31 }
  0x6a   :  { %3295 = vmatmul.mubr.msk.f32.gmra.mrb[14].mxu1 %vm55_vm0, %v4038_v21  ;;  %3551 = vmatpush1.bf16.msra.mxu0 %v4388_v18 }
  0x6b   :  { %3559 = vmatpush1.bf16.msra.mxu1 %v4392_v32  ;;  %2110 = vmatprep.mubr.f32.mxu0 %v3763_v3 }
  0x6c   :  { %2187 = vmatprep.mubr.f32.mxu1 %v3763_v3  ;;  %3561 = vmatprep.subr.bf16.mxu0 %v4206_v48  ;;  %v3586_v48 = vpack.c.bf16 %v3310_v40, %v3306_v39 }
  0x6d   :  { %3296 = vmatmul.mubr.msk.f32.vlgmr.msra.gmra.mrb[16].mxu0 %vm55_vm0, %v3882_v34  ;;  %3569 = vmatprep.subr.bf16.mxu1 %v4217_v51  ;;  %v3580_v51 = vpack.c.bf16 %v3317_v43, %v3313_v42 }
  0x6e   :  { %3298 = vmatmul.mubr.msk.f32.vlgmr.msra.gmra.mrb[16].mxu1 %vm55_vm0, %v3882_v34  ;;  %3563 = vmatpush1.bf16.msra.mxu0 %v4228_v54  ;;  %v3588_v54 = vpack.c.bf16 %v3319_v47, %v3315_v45 }
  0x6f   :  { %3571 = vmatpush1.bf16.msra.mxu1 %v4238_v57  ;;  %2116 = vmatprep.mubr.f32.mxu0 %v3763_v3  ;;  %v3333_v57 = vld [vmem:[%s4637_s0 + $0x388] sm:$0xff] }
  0x70   :  { %2193 = vmatprep.mubr.f32.mxu1 %v3763_v3  ;;  %3565 = vmatprep.subr.bf16.mxu0 %v4248_v60  ;;  %v3339_v60 = vld [vmem:[%s4637_s0 + $0x3b8] sm:$0xff]  ;;  %v3624_v62 = vpack.c.bf16 %v3337_v58, %v3333_v57 }
  0x71   :  { %3297 = vmatmul.mubr.msk.f32.gmra.mrb[18].mxu0 %vm55_vm0, %v3914_v46  ;;  %3573 = vmatprep.subr.bf16.mxu1 %v4259_v0  ;;  %v3334_v0 = vld [vmem:[%s4637_s0 + $0x390] sm:$0xff] }
  0x72   :  { %3299 = vmatmul.mubr.msk.f32.gmra.mrb[18].mxu1 %vm55_vm0, %v3914_v46  ;;  %3567 = vmatpush1.bf16.msra.mxu0 %v4264_v1  ;;  %v3338_v1 = vld [vmem:[%s4637_s0 + $0x3b0] sm:$0xff] }
  0x73   :  { %3575 = vmatpush1.bf16.msra.mxu1 %v4268_v2  ;;  %2264 = vmatprep.mubr.f32.mxu0 %v3763_v3  ;;  %v3632_v2 = vpack.c.bf16 %v3339_v60, %v3335_v59  ;;  %v3634_v12 = vpack.c.bf16 %v3338_v1, %v3334_v0 }
  0x74   :  { %2341 = vmatprep.mubr.f32.mxu1 %v3763_v3  ;;  %3577 = vmatprep.subr.bf16.mxu0 %v3576_v38 }
  0x75   :  { %3300 = vmatmul.mubr.msk.f32.vlgmr.msra.gmra.mrb[16].mxu0 %vm55_vm0, %v3964_v63  ;;  %3585 = vmatprep.subr.bf16.mxu1 %v3584_v41 }
  0x76   :  { %3302 = vmatmul.mubr.msk.f32.vlgmr.msra.gmra.mrb[16].mxu1 %vm55_vm0, %v3964_v63  ;;  %3579 = vmatpush1.bf16.msra.mxu0 %v3578_v44 }
  0x77   :  { %3587 = vmatpush1.bf16.msra.mxu1 %v3586_v48  ;;  %2270 = vmatprep.mubr.f32.mxu0 %v3763_v3 }
  0x78   :  { %2347 = vmatprep.mubr.f32.mxu1 %v3763_v3  ;;  %3581 = vmatprep.subr.bf16.mxu0 %v3580_v51 }
  0x79   :  { %3301 = vmatmul.mubr.msk.f32.gmra.mrb[18].mxu0 %vm55_vm0, %v4004_v15  ;;  %3589 = vmatprep.subr.bf16.mxu1 %v3588_v54 }
  0x7a   :  { %3303 = vmatmul.mubr.msk.f32.gmra.mrb[18].mxu1 %vm55_vm0, %v4004_v15  ;;  %3583 = vmatpush1.bf16.msra.mxu0 %v3582_v55 }
  0x7b   :  { %3591 = vmatpush1.bf16.msra.mxu1 %v3590_v56  ;;  %2435 = vmatprep.mubr.f32.mxu0 %v3763_v3 }
  0x7c   :  { %2512 = vmatprep.mubr.f32.mxu1 %v3763_v3  ;;  %3593 = vmatprep.subr.bf16.mxu0 %v3576_v38 }
  0x7d   :  { %3320 = vmatmul.mubr.msk.f32.vlgmr.msra.gmra.mrb[16].mxu0 %vm55_vm0, %v4023_v20  ;;  %3601 = vmatprep.subr.bf16.mxu1 %v3584_v41 }
  0x7e   :  { %3322 = vmatmul.mubr.msk.f32.vlgmr.msra.gmra.mrb[16].mxu1 %vm55_vm0, %v4023_v20  ;;  %3595 = vmatpush1.bf16.msra.mxu0 %v3578_v44 }
  0x7f   :  { %3603 = vmatpush1.bf16.msra.mxu1 %v3586_v48  ;;  %2441 = vmatprep.mubr.f32.mxu0 %v3763_v3 }
  0x80   :  { %2518 = vmatprep.mubr.f32.mxu1 %v3763_v3  ;;  %3597 = vmatprep.subr.bf16.mxu0 %v3580_v51 }
  0x81   :  { %3321 = vmatmul.mubr.msk.f32.gmra.mrb[18].mxu0 %vm55_vm0, %v4038_v21  ;;  %3605 = vmatprep.subr.bf16.mxu1 %v3588_v54 }
  0x82   :  { %3323 = vmatmul.mubr.msk.f32.gmra.mrb[18].mxu1 %vm55_vm0, %v4038_v21  ;;  %3599 = vmatpush1.bf16.msra.mxu0 %v3582_v55 }
  0x83   :  { %3607 = vmatpush1.bf16.msra.mxu1 %v3590_v56  ;;  %2605 = vmatprep.mubr.f32.mxu0 %v3763_v3 }
  0x84   :  { %2682 = vmatprep.mubr.f32.mxu1 %v3763_v3  ;;  %3609 = vmatprep.subr.bf16.mxu0 %v4330_v14  ;;  %v3344_v14 = vld [vmem:[%s4637_s0 + $0x3e0] sm:$0xff] }
  0x85   :  { %3324 = vmatmul.mubr.msk.f32.vlgmr.msra.gmra.mrb[20].mxu0 %vm55_vm0, %v3882_v34  ;;  %3617 = vmatprep.subr.bf16.mxu1 %v4341_v23  ;;  %v3346_v23 = vld [vmem:[%s4637_s0 + $0x3f0] sm:$0xff] }
  0x86   :  { %3326 = vmatmul.mubr.msk.f32.vlgmr.msra.gmra.mrb[20].mxu1 %vm55_vm0, %v3882_v34  ;;  %3611 = vmatpush1.bf16.msra.mxu0 %v4352_v8  ;;  %v3336_v34 = vld [vmem:[%s4637_s0 + $0x3a0] sm:$0xff]  ;;  %v3638_v8 = vpack.c.bf16 %v3346_v23, %v3342_v19 }
  0x87   :  { %3619 = vmatpush1.bf16.msra.mxu1 %v4362_v27  ;;  %2611 = vmatprep.mubr.f32.mxu0 %v3763_v3  ;;  %v3626_v7 = vpack.c.bf16 %v3336_v34, %v3332_v61 }
  0x88   :  { %2688 = vmatprep.mubr.f32.mxu1 %v3763_v3  ;;  %3613 = vmatprep.subr.bf16.mxu0 %v4372_v29 }
  0x89   :  { %3325 = vmatmul.mubr.msk.f32.gmra.mrb[22].mxu0 %vm55_vm0, %v3914_v46  ;;  %3621 = vmatprep.subr.bf16.mxu1 %v4383_v31 }
  0x8a   :  { %3327 = vmatmul.mubr.msk.f32.gmra.mrb[22].mxu1 %vm55_vm0, %v3914_v46  ;;  %3615 = vmatpush1.bf16.msra.mxu0 %v4388_v18  ;;  %v3340_v46 = vld [vmem:[%s4637_s0 + $0x3c0] sm:$0xff] }
  0x8b   :  { %3623 = vmatpush1.bf16.msra.mxu1 %v4392_v32  ;;  %2759 = vmatprep.mubr.f32.mxu0 %v3763_v3  ;;  %v3630_v4 = vpack.c.bf16 %v3344_v14, %v3340_v46 }
  0x8c   :  { %2836 = vmatprep.mubr.f32.mxu1 %v3763_v3  ;;  %3625 = vmatprep.subr.bf16.mxu0 %v3624_v62 }
  0x8d   :  { %3328 = vmatmul.mubr.msk.f32.vlgmr.msra.gmra.mrb[20].mxu0 %vm55_vm0, %v3964_v63  ;;  %3633 = vmatprep.subr.bf16.mxu1 %v3632_v2 }
  0x8e   :  { %3330 = vmatmul.mubr.msk.f32.vlgmr.msra.gmra.mrb[20].mxu1 %vm55_vm0, %v3964_v63  ;;  %3627 = vmatpush1.bf16.msra.mxu0 %v3626_v7  ;;  %v3036_v63 = vld [vmem:[%s4639_s2] sm:$0xff] }
  0x8f   :  { %3635 = vmatpush1.bf16.msra.mxu1 %v3634_v12  ;;  %2765 = vmatprep.mubr.f32.mxu0 %v3763_v3 }
  0x90   :  { %2842 = vmatprep.mubr.f32.mxu1 %v3763_v3  ;;  %3629 = vmatprep.subr.bf16.mxu0 %v3628_v16 }
  0x91   :  { %3329 = vmatmul.mubr.msk.f32.gmra.mrb[22].mxu0 %vm55_vm0, %v4004_v15  ;;  %3637 = vmatprep.subr.bf16.mxu1 %v3636_v24 }
  0x92   :  { %3331 = vmatmul.mubr.msk.f32.gmra.mrb[22].mxu1 %vm55_vm0, %v4004_v15  ;;  %3631 = vmatpush1.bf16.msra.mxu0 %v3630_v4  ;;  %v3037_v15 = vld [vmem:[%s4639_s2 + $0x8] sm:$0xff] }
  0x93   :  { %3639 = vmatpush1.bf16.msra.mxu1 %v3638_v8  ;;  %2930 = vmatprep.mubr.f32.mxu0 %v3763_v3 }
  0x94   :  { %3007 = vmatprep.mubr.f32.mxu1 %v3763_v3  ;;  %3738 = vset.pattern.permute.xlu0 %v3764_v26 }
  0x95   :  { %3348 = vmatmul.mubr.msk.f32.vlgmr.msra.gmra.mrb[20].mxu0 %vm55_vm0, %v4023_v20  ;;  %3040 = vperm.xlu0 %3738, %v3036_v63  }
  0x96   :  { %3350 = vmatmul.mubr.msk.f32.vlgmr.msra.gmra.mrb[20].mxu1 %vm55_vm0, %v4023_v20  ;;  %2936 = vmatprep.mubr.f32.mxu0 %v3763_v3 }
  0x97   :  { %3013 = vmatprep.mubr.f32.mxu1 %v3763_v3 }
  0x99   :  { %3349 = vmatmul.mubr.msk.f32.gmra.mrb[22].mxu0 %vm55_vm0, %v4038_v21  ;;  %3045 = vperm.xlu0 %3738, %v3037_v15  }
  0x9a   :  { %3351 = vmatmul.mubr.msk.f32.gmra.mrb[22].mxu1 %vm55_vm0, %v4038_v21 }
  0xf0   :  { %v465_v9 = vpop.f32.mrb[0].mxu0 }
  0xf1   :  { %v542_v27 = vpop.f32.mrb[0].mxu1  ;;  %v467_v13 = vpop.f32.mrb[1].mxu0 }
  0xf2   :  { %v544_v28 = vpop.f32.mrb[1].mxu1 }
  0xf4   :  { %v471_v20 = vpop.f32.mrb[2].mxu0 }
  0xf5   :  { %v548_v29 = vpop.f32.mrb[2].mxu1  ;;  %v473_v17 = vpop.f32.mrb[3].mxu0 }
  0xf6   :  { %v550_v30 = vpop.f32.mrb[3].mxu1 }
 0x108   :  { %v952_v31 = vpop.f32.mrb[4].mxu0 }
 0x109   :  { %v1048_v18 = vmin.f32 %v465_v9, %v952_v31  ;;  %v1029_v32 = vpop.f32.mrb[4].mxu1  ;;  %v954_v33 = vpop.f32.mrb[5].mxu0 }
 0x10a   :  { %v1050_v3 = vmin.f32 %v542_v27, %v1029_v32  ;;  %v1049_v22 = vmin.f32 %v467_v13, %v954_v33  ;;  %v1031_v35 = vpop.f32.mrb[5].mxu1 }
 0x10b   :  { %v1051_v36 = vmin.f32 %v544_v28, %v1031_v35 }
 0x10c   :  { %v958_v25 = vpop.f32.mrb[6].mxu0 }
 0x10d   :  { %v1052_v37 = vmin.f32 %v471_v20, %v958_v25  ;;  %v1035_v38 = vpop.f32.mrb[6].mxu1  ;;  %v960_v21 = vpop.f32.mrb[7].mxu0 }
 0x10e   :  { %v1054_v39 = vmin.f32 %v548_v29, %v1035_v38  ;;  %v1053_v40 = vmin.f32 %v473_v17, %v960_v21  ;;  %v1037_v41 = vpop.f32.mrb[7].mxu1 }
 0x10f   :  { %v1055_v42 = vmin.f32 %v550_v30, %v1037_v41 }
 0x114   :  { %v3041_v31 = vpop.permute.xlu0 %3040 }
 0x120   :  { %v1447_v43 = vpop.f32.mrb[8].mxu0 }
 0x121   :  { %v1543_v44 = vmin.f32 %v1048_v18, %v1447_v43  ;;  %v1524_v45 = vpop.f32.mrb[8].mxu1  ;;  %v1449_v47 = vpop.f32.mrb[9].mxu0 }
 0x122   :  { %v1545_v48 = vmin.f32 %v1050_v3, %v1524_v45  ;;  %v1544_v49 = vmin.f32 %v1049_v22, %v1449_v47  ;;  %v1526_v50 = vpop.f32.mrb[9].mxu1 }
 0x123   :  { %v1546_v51 = vmin.f32 %v1051_v36, %v1526_v50 }
 0x124   :  { %v1453_v52 = vpop.f32.mrb[10].mxu0 }
 0x125   :  { %v1547_v53 = vmin.f32 %v1052_v37, %v1453_v52  ;;  %v1530_v54 = vpop.f32.mrb[10].mxu1  ;;  %v1455_v55 = vpop.f32.mrb[11].mxu0 }
 0x126   :  { %v1549_v56 = vmin.f32 %v1054_v39, %v1530_v54  ;;  %v1548_v57 = vmin.f32 %v1053_v40, %v1455_v55  ;;  %v1532_v58 = vpop.f32.mrb[11].mxu1  ;;  %v3046_v40 = vpop.permute.xlu0 %3045 }
 0x127   :  { %v1550_v59 = vmin.f32 %v1055_v42, %v1532_v58 }
 0x138   :  { %v1942_v60 = vpop.f32.mrb[12].mxu0 }
 0x139   :  { %v2038_v61 = vmin.f32 %v1543_v44, %v1942_v60  ;;  %v2019_v34 = vpop.f32.mrb[12].mxu1  ;;  %v1944_v62 = vpop.f32.mrb[13].mxu0 }
 0x13a   :  { %v2040_v0 = vmin.f32 %v1545_v48, %v2019_v34  ;;  %v2039_v1 = vmin.f32 %v1544_v49, %v1944_v62  ;;  %v2021_v2 = vpop.f32.mrb[13].mxu1 }
 0x13b   :  { %v2041_v5 = vmin.f32 %v1546_v51, %v2021_v2 }
 0x13c   :  { %v1948_v6 = vpop.f32.mrb[14].mxu0 }
 0x13d   :  { %v2042_v7 = vmin.f32 %v1547_v53, %v1948_v6  ;;  %v2025_v10 = vpop.f32.mrb[14].mxu1  ;;  %v1950_v11 = vpop.f32.mrb[15].mxu0 }
 0x13e   :  { %v2044_v12 = vmin.f32 %v1549_v56, %v2025_v10  ;;  %v2043_v46 = vmin.f32 %v1548_v57, %v1950_v11  ;;  %v2027_v14 = vpop.f32.mrb[15].mxu1 }
 0x13f   :  { %v2045_v16 = vmin.f32 %v1550_v59, %v2027_v14 }
 0x150   :  { %v2437_v19 = vpop.f32.mrb[16].mxu0 }
 0x151   :  { %v2533_v23 = vmin.f32 %v2038_v61, %v2437_v19  ;;  %v2514_v24 = vpop.f32.mrb[16].mxu1  ;;  %v2439_v4 = vpop.f32.mrb[17].mxu0 }
 0x152   :  { %v2535_v8 = vmin.f32 %v2040_v0, %v2514_v24  ;;  %v2534_v63 = vmin.f32 %v2039_v1, %v2439_v4  ;;  %v2516_v26 = vpop.f32.mrb[17].mxu1 }
 0x153   :  { %v2536_v15 = vmin.f32 %v2041_v5, %v2516_v26 }
 0x154   :  { %v2443_v9 = vpop.f32.mrb[18].mxu0 }
 0x155   :  { %v2537_v27 = vmin.f32 %v2042_v7, %v2443_v9  ;;  %v2520_v13 = vpop.f32.mrb[18].mxu1  ;;  %v2445_v28 = vpop.f32.mrb[19].mxu0 }
 0x156   :  { %v2539_v20 = vmin.f32 %v2044_v12, %v2520_v13  ;;  %v2538_v29 = vmin.f32 %v2043_v46, %v2445_v28  ;;  %v2522_v17 = vpop.f32.mrb[19].mxu1 }
 0x157   :  { %v2540_v30 = vmin.f32 %v2045_v16, %v2522_v17 }
 0x168   :  { %v2932_v18 = vpop.f32.mrb[20].mxu0 }
 0x169   :  { %v3028_v32 = vmin.f32 %v2533_v23, %v2932_v18  ;;  %v3009_v33 = vpop.f32.mrb[20].mxu1  ;;  %v2934_v3 = vpop.f32.mrb[21].mxu0 }
 0x16a   :  { %v3030_v22 = vmin.f32 %v2535_v8, %v3009_v33  ;;  %v3029_v35 = vmin.f32 %v2534_v63, %v2934_v3  ;;  %v3011_v36 = vpop.f32.mrb[21].mxu1 }
 0x16b   :  { %v3031_v25 = vmin.f32 %v2536_v15, %v3011_v36  ;;  %v3048_v44 = vadd.f32 %v3041_v31, %v3028_v32 }
 0x16c   :  { %v2938_v37 = vpop.f32.mrb[22].mxu0  ;;  %v3050_v48 = vadd.f32 %v3041_v31, %v3030_v22  ;;  %v3049_v49 = vadd.f32 %v3041_v31, %v3029_v35 }
 0x16d   :  { %v3032_v38 = vmin.f32 %v2537_v27, %v2938_v37  ;;  %v3015_v21 = vpop.f32.mrb[22].mxu1  ;;  %v2940_v39 = vpop.f32.mrb[23].mxu0  ;;  %v3051_v52 = vadd.f32 %v3041_v31, %v3031_v25 }
 0x16e   :  { %v3034_v41 = vmin.f32 %v2539_v20, %v3015_v21  ;;  %v3033_v42 = vmin.f32 %v2538_v29, %v2940_v39  ;;  %v3017_v43 = vpop.f32.mrb[23].mxu1 }
 0x16f   :  { %v3052_v45 = vadd.f32 %v3046_v40, %v3032_v38  ;;  %v3035_v47 = vmin.f32 %v2540_v30, %v3017_v43 }
 0x170   :  { %v3054_v50 = vadd.f32 %v3046_v40, %v3034_v41  ;;  %v3053_v51 = vadd.f32 %v3046_v40, %v3033_v42 }
 0x171   :  { %v3056_v53 = vmax.f32 %v3048_v44, %v3052_v45  ;;  %v3055_v54 = vadd.f32 %v3046_v40, %v3035_v47 }
 0x172   :  { %v3070_v55 = vmax.f32 %v3050_v48, %v3054_v50  ;;  %v3063_v56 = vmax.f32 %v3049_v49, %v3053_v51 }
 0x173   :  { %v3057_v57 = vrot.slane %v3056_v53, 4  ;;  %v3077_v58 = vmax.f32 %v3051_v52, %v3055_v54 }
 0x174   :  { %v3071_v59 = vrot.slane %v3070_v55, 4  ;;  %v3064_v60 = vrot.slane %v3063_v56, 4 }
 0x175   :  { %v3058_v61 = vmax.f32 %v3056_v53, %v3057_v57  ;;  %v3078_v34 = vrot.slane %v3077_v58, 4 }
 0x176   :  { %v3072_v62 = vmax.f32 %v3070_v55, %v3071_v59  ;;  %v3065_v0 = vmax.f32 %v3063_v56, %v3064_v60 }
 0x177   :  { %v3059_v1 = vrot.slane %v3058_v61, 2  ;;  %v3079_v2 = vmax.f32 %v3077_v58, %v3078_v34 }
 0x178   :  { %v3073_v5 = vrot.slane %v3072_v62, 2  ;;  %v3066_v6 = vrot.slane %v3065_v0, 2 }
 0x179   :  { %v3060_v7 = vmax.f32 %v3058_v61, %v3059_v1  ;;  %v3080_v10 = vrot.slane %v3079_v2, 2 }
 0x17a   :  { %v3074_v11 = vmax.f32 %v3072_v62, %v3073_v5  ;;  %v3067_v12 = vmax.f32 %v3065_v0, %v3066_v6 }
 0x17b   :  { %v3061_v46 = vrot.slane %v3060_v7, 1  ;;  %v3081_v14 = vmax.f32 %v3079_v2, %v3080_v10 }
 0x17c   :  { %v3075_v16 = vrot.slane %v3074_v11, 1  ;;  %v3068_v19 = vrot.slane %v3067_v12, 1 }
 0x17d   :  { %v3062_v23 = vmax.f32 %v3060_v7, %v3061_v46  ;;  %v3082_v24 = vrot.slane %v3081_v14, 1 }
 0x17e   :  { %v3076_v4 = vmax.f32 %v3074_v11, %v3075_v16  ;;  %v3069_v8 = vmax.f32 %v3067_v12, %v3068_v19 }
 0x17f   :  { %v3084_v63 = vsub.f32 %v3048_v44, %v3062_v23  ;;  %v3088_v26 = vsub.f32 %v3052_v45, %v3062_v23  ;;  %v3083_v15 = vmax.f32 %v3081_v14, %v3082_v24 }
 0x180   :  { %v3086_v9 = vsub.f32 %v3050_v48, %v3076_v4  ;;  %v3090_v27 = vsub.f32 %v3054_v50, %v3076_v4  ;;  %v3085_v13 = vsub.f32 %v3049_v49, %v3069_v8  ;;  %v3089_v28 = vsub.f32 %v3053_v51, %v3069_v8 }
 0x181   :  { %v3092_v20 = vmul.f32 1.442695, %v3084_v63  ;;  %v3100_v29 = vmul.f32 1.442695, %v3088_v26  ;;  %v3087_v17 = vsub.f32 %v3051_v52, %v3083_v15  ;;  %v3091_v30 = vsub.f32 %v3055_v54, %v3083_v15 }
 0x182   :  { %v3096_v31 = vmul.f32 1.442695, %v3086_v9  ;;  %v3104_v18 = vmul.f32 1.442695, %v3090_v27  ;;  %v3094_v32 = vmul.f32 1.442695, %v3085_v13 }
 0x183   :  { %3739 = vpow2.f32 %v3092_v20  ;;  %v3102_v33 = vmul.f32 1.442695, %v3089_v28  ;;  %v3098_v3 = vmul.f32 1.442695, %v3087_v17  ;;  %v3106_v22 = vmul.f32 1.442695, %v3091_v30 }
 0x184   :  { %3741 = vpow2.f32 %v3100_v29 }
 0x185   :  { %3743 = vpow2.f32 %v3096_v31 }
 0x186   :  { %3745 = vpow2.f32 %v3104_v18 }
 0x187   :  { %3747 = vpow2.f32 %v3094_v32 }
 0x188   :  { %3749 = vpow2.f32 %v3102_v33 }
 0x189   :  { %3751 = vpow2.f32 %v3098_v3 }
 0x18a   :  { %3753 = vpow2.f32 %v3106_v22 }
 0x18d   :  { %v3740_v35 = vpop.eup %3739 }
 0x18e   :  { %v3742_v36 = vpop.eup %3741 }
 0x18f   :  { %v3744_v25 = vpop.eup %3743  ;;  %v3108_v37 = vadd.f32 %v3742_v36, %v3740_v35 }
 0x190   :  { %v3746_v38 = vpop.eup %3745 }
 0x191   :  { %v3748_v21 = vpop.eup %3747  ;;  %v3109_v39 = vrot.slane %v3108_v37, 4  ;;  %v3122_v40 = vadd.f32 %v3746_v38, %v3744_v25 }
 0x192   :  { %v3750_v41 = vpop.eup %3749 }
 0x193   :  { %v3752_v42 = vpop.eup %3751  ;;  %v3110_v43 = vadd.f32 %v3109_v39, %v3108_v37  ;;  %v3123_v44 = vrot.slane %v3122_v40, 4  ;;  %v3115_v45 = vadd.f32 %v3750_v41, %v3748_v21 }
 0x194   :  { %v3754_v47 = vpop.eup %3753 }
 0x195   :  { %v3111_v48 = vrot.slane %v3110_v43, 2  ;;  %v3124_v49 = vadd.f32 %v3123_v44, %v3122_v40  ;;  %v3116_v50 = vrot.slane %v3115_v45, 4  ;;  %v3129_v51 = vadd.f32 %v3754_v47, %v3752_v42 }
 0x197   :  { %v3112_v52 = vadd.f32 %v3111_v48, %v3110_v43  ;;  %v3125_v53 = vrot.slane %v3124_v49, 2  ;;  %v3117_v54 = vadd.f32 %v3116_v50, %v3115_v45  ;;  %v3130_v55 = vrot.slane %v3129_v51, 4 }
 0x199   :  { %v3113_v56 = vrot.slane %v3112_v52, 1  ;;  %v3126_v57 = vadd.f32 %v3125_v53, %v3124_v49  ;;  %v3118_v58 = vrot.slane %v3117_v54, 2  ;;  %v3131_v59 = vadd.f32 %v3130_v55, %v3129_v51 }
 0x19b   :  { %v3114_v60 = vadd.f32 %v3113_v56, %v3112_v52  ;;  %v3127_v61 = vrot.slane %v3126_v57, 1  ;;  %v3119_v34 = vadd.f32 %v3118_v58, %v3117_v54  ;;  %v3132_v62 = vrot.slane %v3131_v59, 2 }
 0x19d   :  { %3755 = vrcp.f32 %v3114_v60  ;;  %v3128_v0 = vadd.f32 %v3127_v61, %v3126_v57  ;;  %v3120_v1 = vrot.slane %v3119_v34, 1  ;;  %v3133_v2 = vadd.f32 %v3132_v62, %v3131_v59 }
 0x19f   :  { %3757 = vrcp.f32 %v3128_v0  ;;  %v3121_v5 = vadd.f32 %v3120_v1, %v3119_v34  ;;  %v3134_v6 = vrot.slane %v3133_v2, 1 }
 0x1a1   :  { %3759 = vrcp.f32 %v3121_v5  ;;  %v3135_v7 = vadd.f32 %v3134_v6, %v3133_v2 }
 0x1a3   :  { %3761 = vrcp.f32 %v3135_v7 }
 0x1a7   :  { %v3756_v10 = vpop.eup %3755 }
 0x1a8   :  { %v3144_v11 = vmul.f32 %v3756_v10, %v3740_v35  ;;  %v3148_v12 = vmul.f32 %v3756_v10, %v3742_v36 }
 0x1a9   :  { %v3758_v46 = vpop.eup %3757 }
 0x1aa   :  { %3152 = vst [vmem:[%s4640_s3] sm:$0xff] %v3144_v11  ;;  %3156 = vst [vmem:[%s4640_s3 + $0x20] sm:$0xff] %v3148_v12  ;;  %v3146_v14 = vmul.f32 %v3758_v46, %v3744_v25  ;;  %v3150_v16 = vmul.f32 %v3758_v46, %v3746_v38 }
 0x1ab   :  { %v3760_v19 = vpop.eup %3759 }
 0x1ac   :  { %3154 = vst [vmem:[%s4640_s3 + $0x10] sm:$0xff] %v3146_v14  ;;  %3158 = vst [vmem:[%s4640_s3 + $0x30] sm:$0xff] %v3150_v16  ;;  %v3145_v23 = vmul.f32 %v3760_v19, %v3748_v21  ;;  %v3149_v24 = vmul.f32 %v3760_v19, %v3750_v41 }
 0x1ad   :  { %v3762_v4 = vpop.eup %3761 }
 0x1ae   :  { %3153 = vst [vmem:[%s4640_s3 + $0x8] sm:$0xff] %v3145_v23  ;;  %3157 = vst [vmem:[%s4640_s3 + $0x28] sm:$0xff] %v3149_v24  ;;  %v3147_v8 = vmul.f32 %v3762_v4, %v3752_v42  ;;  %v3151_v63 = vmul.f32 %v3762_v4, %v3754_v47 }
 0x1b0   :  { %3155 = vst [vmem:[%s4640_s3 + $0x18] sm:$0xff] %v3147_v8  ;;  %3159 = vst [vmem:[%s4640_s3 + $0x38] sm:$0xff] %v3151_v63 }

</bundles_post_ra>
